<compile_context>
chip_gen: v7x
topology: tpu7x:2x2x1
jax: 0.10.0
libtpu: 0.0.40
codegen_flags: <defaults>
</compile_context>

<pallas_src>
import functools

import jax
import jax.numpy as jnp
from jax.experimental import pallas as pl
from jax.experimental.pallas import tpu as pltpu


# Safe on every generation (v5e/v6e: 128 MiB physical, v7x: 64 MiB).
# TODO(synk): raise to 64-100 MiB (and grow row/q tiles) on v5e/v6e; on v7x
# keep 32 MiB and add a streamed-K (flash-style) grid axis for long Lk.
_VMEM_LIMIT = 32 * 1024 * 1024


def _layernorm(x, gamma, beta, eps=1e-6):
    # Module constructs nn.LayerNorm(..., eps=1e-06) -> eps=1e-6 is exact.
    mean = jnp.mean(x, axis=-1, keepdims=True)
    xc = x - mean
    var = jnp.mean(xc * xc, axis=-1, keepdims=True)
    inv = jax.lax.rsqrt(var + eps)
    return xc * inv * gamma + beta


def _pick_row_tile(rows, max_tile=512, min_steps=1):
    """Largest multiple-of-8 tile dividing `rows` that still leaves at least
    `min_steps` grid steps (so megacore sharding / pipelining engage)."""
    candidates = (512, 256, 128, 64, 32, 16, 8)
    for t in candidates:
        if t <= max_tile and t <= rows and rows % t == 0 and rows // t >= min_steps:
            return t
    for t in candidates:
        if t <= max_tile and t <= rows and rows % t == 0:
            return t
    return rows  # full-extent block is always a legal block shape


# ------------------------------------------------------------------ stage 1 --
def _matmul_rows_kernel(x_ref, w_ref, o_ref):
    o_ref[...] = jnp.dot(x_ref[...], w_ref[...],
                         preferred_element_type=jnp.float32).astype(o_ref.dtype)


def _matmul_rows(x, w, *, max_row_tile=512):
    """Row-tiled x @ w; the weight stays resident in VMEM (constant index)."""
    R, K = x.shape
    N = w.shape[1]
    tr = _pick_row_tile(R, max_row_tile, min_steps=2)
    # TODO(synk): on v7x mark the weight spec pipeline_mode=pl.Buffered(1)
    # (constant index -> no double-buffering needed) and use bf16 operands.
    return pl.pallas_call(
        _matmul_rows_kernel,
        out_shape=jax.ShapeDtypeStruct((R, N), x.dtype),
        grid_spec=pltpu.PrefetchScalarGridSpec(
            num_scalar_prefetch=0,
            grid=(R // tr,),
            in_specs=[pl.BlockSpec((tr, K), lambda i: (i, 0)),
                      pl.BlockSpec((K, N), lambda i: (0, 0))],  # constant index
            out_specs=pl.BlockSpec((tr, N), lambda i: (i, 0)),
        ),
        compiler_params=pltpu.CompilerParams(
            dimension_semantics=("parallel",),
            vmem_limit_bytes=_VMEM_LIMIT),
    )(x, w)


# ------------------------------------------------------------------ stage 2 --
def _fused_attn_ffn_kernel(q_ref, kv_ref, w_q_ref, w_fc_ref,
                           ln1_g_ref, ln1_b_ref,
                           w1_ref, b1_ref, w2_ref, b2_ref,
                           ln2_g_ref, ln2_b_ref,
                           o_ref, *, n_head, d_k, d_v, shared_kv):
    x = q_ref[0]                                                # (tq, d_model)
    # Q projection: 1/temperature already folded into w_q on the host.
    qp = jnp.dot(x, w_q_ref[...], preferred_element_type=jnp.float32)  # (tq, H*d_k)
    k2 = kv_ref[0, 0]                                           # (Lk, H*d_k)
    v2 = k2 if shared_kv else kv_ref[1, 0]                      # (Lk, H*d_v)

    # Heads are split with static lane slices on VMEM values (no HBM transpose,
    # no head-minor DMA).  The fc projection is folded into the per-head output
    # dot, so no head-minor store / concatenate ever exists.  MXU is underfed
    # at d_k=32, but this core is store/DMA/overhead-bound, so that is fine.
    # TODO(synk): for long Lk add a K-tile grid axis with online-softmax
    # (flash-style) scratch so K/V stream instead of being fully resident.
    fc = None
    for h in range(n_head):
        qh = qp[:, h * d_k:(h + 1) * d_k]                       # (tq, d_k)
        kh = k2[:, h * d_k:(h + 1) * d_k]                       # (Lk, d_k)
        # q @ k^T via dot_general contracting both minor dims (no transpose).
        s = jax.lax.dot_general(qh, kh, (((1,), (1,)), ((), ())),
                                preferred_element_type=jnp.float32)  # (tq, Lk)
        s = s - jnp.max(s, axis=-1, keepdims=True)
        e = jnp.exp(s)
        p = e / jnp.sum(e, axis=-1, keepdims=True)   # exact softmax (matches ref)
        # attention dropout: identity (eval mode)
        vh = v2[:, h * d_v:(h + 1) * d_v]                       # (Lk, d_v)
        oh = jnp.dot(p, vh, preferred_element_type=jnp.float32)  # (tq, d_v)
        c = jnp.dot(oh, w_fc_ref[h * d_v:(h + 1) * d_v, :],
                    preferred_element_type=jnp.float32)          # (tq, d_model)
        fc = c if fc is None else fc + c

    # fc dropout: identity (eval mode); residual + LayerNorm.
    y = fc + x
    y = _layernorm(y, ln1_g_ref[...], ln1_b_ref[...])

    # PositionwiseFeedForward: w2(relu(w1(y))) + residual, LayerNorm.
    h1 = jnp.dot(y, w1_ref[...], preferred_element_type=jnp.float32) + b1_ref[...]
    h1 = jnp.maximum(h1, 0.0)
    z = jnp.dot(h1, w2_ref[...], preferred_element_type=jnp.float32)
    z = z + b2_ref[...] + y
    z = _layernorm(z, ln2_g_ref[...], ln2_b_ref[...])
    o_ref[0] = z.astype(o_ref.dtype)   # single lane-dense (tq, d_model) store


def _fused_attention_block(q, kvp, params, *, n_head, d_k, d_v, shared_kv,
                           max_q_tile=256):
    B, Lq, d_model = q.shape
    KV, _, Lk, hdk = kvp.shape
    # Need >=2 total grid steps for megacore; batch axis usually provides them.
    tq = _pick_row_tile(Lq, max_q_tile, min_steps=2 if B == 1 else 1)

    weights = [params["w_q"], params["w_fc"],
               params["ln1_g"], params["ln1_b"],
               params["w1"], params["b1"], params["w2"], params["b2"],
               params["ln2_g"], params["ln2_b"]]

    def const_spec(shape):
        nd = len(shape)
        return pl.BlockSpec(shape, lambda b, qi, _nd=nd: (0,) * _nd)

    kernel = functools.partial(_fused_attn_ffn_kernel, n_head=n_head,
                               d_k=d_k, d_v=d_v, shared_kv=shared_kv)
    return pl.pallas_call(
        kernel,
        out_shape=jax.ShapeDtypeStruct((B, Lq, d_model), q.dtype),
        grid_spec=pltpu.PrefetchScalarGridSpec(
            num_scalar_prefetch=0,
            grid=(B, Lq // tq),          # both axes parallel -> both v7x TCs
            in_specs=[
                pl.BlockSpec((1, tq, d_model), lambda b, qi: (b, qi, 0)),
                pl.BlockSpec((KV, 1, Lk, hdk), lambda b, qi: (0, b, 0, 0)),
            ] + [const_spec(w.shape) for w in weights],
            out_specs=pl.BlockSpec((1, tq, d_model), lambda b, qi: (b, qi, 0)),
        ),
        compiler_params=pltpu.CompilerParams(
            dimension_semantics=("parallel", "parallel"),
            vmem_limit_bytes=_VMEM_LIMIT),
    )(q, kvp, *weights)


# ------------------------------------------------------------------ wrapper --
def attention_block(q, k, v, params, *, n_head, d_k, d_v):
    """AttentionBlock.forward with flag=True, eval mode (dropout = identity)."""
    B, Lq, d_model = q.shape
    Lk = k.shape[1]

    # flag=True reuses the `cls` projection for both K and V -> needs d_k == d_v.
    assert d_k == d_v, "flag=True path requires d_k == d_v"
    assert v.shape[1] == Lk, "attention requires len_k == len_v"
    assert params["w1"].shape[0] == d_model, "FFN d_in must equal d_model"

    # Fold 1/temperature into the Q-projection weight (host-side, free).
    inv_temp = 1.0 / (d_k ** 0.5)
    fused_params = dict(params)
    fused_params["w_q"] = params["w_img"] * inv_temp

    # ---- stage 1: one fused K/V projection (both use w_cls) ----
    shared_kv = k is v
    k2 = k.reshape(B * Lk, d_model)
    if shared_kv:
        kv_in, KV = k2, 1
    else:
        kv_in, KV = jnp.concatenate([k2, v.reshape(B * Lk, d_model)], axis=0), 2
    kvp = _matmul_rows(kv_in, params["w_cls"])           # (KV*B*Lk, H*d_k)
    kvp = kvp.reshape(KV, B, Lk, n_head * d_k)           # free reshape, no transpose

    # ---- stage 2: fused Q-proj + attention + fc + residual + LN + FFN + LN ----
    return _fused_attention_block(q, kvp, fused_params, n_head=n_head,
                                  d_k=d_k, d_v=d_v, shared_kv=shared_kv)


# ---------------------------------------------------------------- reference --
def attention_block_reference(q, k, v, params, *, n_head, d_k, d_v):
    """Pure-JAX reference mirroring the PyTorch forward (flag=True, eval)."""
    B, Lq, d_model = q.shape
    residual = q
    qp = (q @ params["w_img"]).reshape(B, Lq, n_head, d_k)
    kp = (k @ params["w_cls"]).reshape(B, k.shape[1], n_head, d_k)
    vp = (v @ params["w_cls"]).reshape(B, v.shape[1], n_head, d_v)
    qp, kp, vp = (jnp.swapaxes(t, 1, 2) for t in (qp, kp, vp))
    scores = jnp.einsum("bhqd,bhkd->bhqk", qp / (d_k ** 0.5), kp)
    attn = jax.nn.softmax(scores, axis=-1)
    out = jnp.einsum("bhqk,bhkd->bhqd", attn, vp)
    out = jnp.swapaxes(out, 1, 2).reshape(B, Lq, n_head * d_v)
    out = out @ params["w_fc"] + residual
    out = _layernorm(out, params["ln1_g"], params["ln1_b"])
    h = jax.nn.relu(out @ params["w1"] + params["b1"])
    y = h @ params["w2"] + params["b2"] + out
    y = _layernorm(y, params["ln2_g"], params["ln2_b"])
    return y


if __name__ == "__main__":
    # Keep reference XLA matmuls and in-kernel dots at full f32 precision so
    # the comparison is apples-to-apples on real TPUs.
    jax.config.update("jax_default_matmul_precision", "highest")

    # Small shapes consistent with the module.  d_model = n_head * d_k = 128 so
    # all activation / output last dims are lane-dense (multiples of 128).
    B, L = 2, 16
    n_head, d_k, d_v = 4, 32, 32
    d_model = n_head * d_k          # 128
    d_in, d_hid = d_model, 256

    key = jax.random.PRNGKey(0)
    ks = jax.random.split(key, 10)
    scale = 0.1
    params = {
        "w_img": scale * jax.random.normal(ks[0], (d_model, n_head * d_v), jnp.float32),
        "w_cls": scale * jax.random.normal(ks[1], (d_model, n_head * d_k), jnp.float32),
        "w_fc":  scale * jax.random.normal(ks[2], (n_head * d_v, d_model), jnp.float32),
        "ln1_g": jnp.ones((1, d_model), jnp.float32),
        "ln1_b": jnp.zeros((1, d_model), jnp.float32),
        "w1":    scale * jax.random.normal(ks[3], (d_in, d_hid), jnp.float32),
        "b1":    scale * jax.random.normal(ks[4], (1, d_hid), jnp.float32),
        "w2":    scale * jax.random.normal(ks[5], (d_hid, d_in), jnp.float32),
        "b2":    scale * jax.random.normal(ks[6], (1, d_in), jnp.float32),
        "ln2_g": jnp.ones((1, d_model), jnp.float32),
        "ln2_b": jnp.zeros((1, d_model), jnp.float32),
    }

    q = jax.random.normal(ks[7], (B, L, d_model), jnp.float32)
    k = jax.random.normal(ks[8], (B, L, d_model), jnp.float32)
    v = jax.random.normal(ks[9], (B, L, d_model), jnp.float32)

    out = attention_block(q, k, v, params, n_head=n_head, d_k=d_k, d_v=d_v)
    out = jax.block_until_ready(out)

    ref = attention_block_reference(q, k, v, params, n_head=n_head, d_k=d_k, d_v=d_v)
    assert out.shape == (B, L, d_model)
    assert jnp.allclose(out, ref, atol=2e-3, rtol=2e-3), "mismatch vs JAX reference"

    print("KERNEL_OK")
</pallas_src>

<mosaic_0001>
module attributes {stable_mosaic.version = 11 : i64} {
  func.func @_matmul_rows_kernel(%arg0: i32, %arg1: memref<32x128xf32, #tpu.memory_space<vmem>>, %arg2: memref<128x128xf32, #tpu.memory_space<vmem>>, %arg3: memref<32x128xf32, #tpu.memory_space<vmem>>) attributes {dimension_semantics = [#tpu.dimension_semantics<parallel>], iteration_bounds = array<i64: 2>, scalar_prefetch = 0 : i64, scratch_operands = 0 : i64, tpu.core_type = #tpu.core_type<tc>, window_params = [{transform_indices = @transform_0, window_bounds = array<i64: 32, 128>}, {pipeline_mode = #tpu.pipeline_mode<synchronous>, transform_indices = @transform_1, window_bounds = array<i64: 128, 128>}, {transform_indices = @transform_2, window_bounds = array<i64: 32, 128>}]} {
    %c0 = arith.constant 0 : index
    %c0_0 = arith.constant 0 : index
    %0 = vector.load %arg1[%c0, %c0_0] : memref<32x128xf32, #tpu.memory_space<vmem>>, vector<32x128xf32>
    %c0_1 = arith.constant 0 : index
    %c0_2 = arith.constant 0 : index
    %1 = vector.load %arg2[%c0_1, %c0_2] : memref<128x128xf32, #tpu.memory_space<vmem>>, vector<128x128xf32>
    %cst = arith.constant dense<0.000000e+00> : vector<32x128xf32>
    %2 = tpu.matmul %0, %1, %cst {dimension_numbers = #tpu.dot_dimension_numbers<[1], [0], [0], [1], [0, 0, 1, 1], [], []>, precision = #tpu.contract_precision<fp32>} : vector<32x128xf32>, vector<128x128xf32>, vector<32x128xf32> -> vector<32x128xf32>
    %c0_3 = arith.constant 0 : index
    %c0_4 = arith.constant 0 : index
    %3 = vector.load %arg3[%c0_3, %c0_4] : memref<32x128xf32, #tpu.memory_space<vmem>>, vector<32x128xf32>
    tpu.vector_store %arg3[%c0_3, %c0_4], %2 {strides = array<i32>} : memref<32x128xf32, #tpu.memory_space<vmem>>, vector<32x128xf32>,
    return
  }
  func.func @transform_0(%arg0: i32) -> (i32, i32) {
    %c0_i32 = arith.constant 0 : i32
    %c0_i32_0 = arith.constant 0 : i32
    return %arg0, %c0_i32 : i32, i32
  }
  func.func @transform_1(%arg0: i32) -> (i32, i32) {
    %c0_i32 = arith.constant 0 : i32
    %c0_i32_0 = arith.constant 0 : i32
    %c0_i32_1 = arith.constant 0 : i32
    return %c0_i32, %c0_i32_0 : i32, i32
  }
  func.func @transform_2(%arg0: i32) -> (i32, i32) {
    %c0_i32 = arith.constant 0 : i32
    %c0_i32_0 = arith.constant 0 : i32
    return %arg0, %c0_i32 : i32, i32
  }
}

</mosaic_0001>

<bundles_post_ra>
// kernel: tpu_custom_call.1
= control target key start
LH: loop header
LB: loop body
LE: loop exit
PB: predicated region body
PF: predicated region fallthrough
CT: control target
= control target key end

     0   :  { %7 = vsyncpa [#allocation3], 0  ;;  %s2362_s0 = inlined_call_operand.hbm [shape: f32[64,128], index: 0, kind: input, shape index: {}]   ;;  %s2363_s1 = inlined_call_operand.hbm [shape: f32[128,128], index: 1, kind: input, shape index: {}]   ;;  %s2364_s2 = inlined_call_operand.hbm [shape: f32[64,128], index: 2, kind: output, shape index: {}]  }
   0x1   :  { %9 = vsyncpa [#allocation3 + $0x1], 0 }
   0x2   :  { %10 = vsyncpa [#allocation6], 0 }
   0x3   :  { %11 = vsyncpa [#allocation4], 0 }
   0x4   :  { %13 = vsyncpa [#allocation4 + $0x1], 0  ;;  %s1861_s9 = smov 0   ;;  %s1863_s10 = smov 0  }
   0x5   :  { %s1865_s11 = smov 0   ;;  %s1867_s12 = smov 0  }
   0x6 LB: > { %s1882_s13 = sadd.s32 4294967295, %s1837_s12   ;;  %s1070_s14 = sadd.s32 4294967294, %s1837_s12   ;;  %s1837_s12 = sphi %s1867_s12, %s2388_s12   ;;  %s1833_s11 = sphi %s1865_s11, %s2387_s11   ;;  %s1829_s10 = sphi %s1863_s10, %s2386_s10   ;;  %s1825_s9 = sphi %s1861_s9, %s2385_s9  }
   0x7   : > { %p39_p0 = scmp.ne.s32.totalorder %s1829_s10, %s1825_s9  ;;  %p2365_p1 = scmp.eq.s32.totalorder %s1882_s13, 0 }
   0x8   : > { %p90_p3 = scmp.eq.s32.totalorder %s1070_s14, 1  ;;  %p1071_p5 = scmp.ge.s32.totalorder %s1837_s12, 1 }
   0x9   : > { %p1891_p4 = por %p2365_p1, %p39_p0  ;;  %p97_p7 = scmp.lt.s32.totalorder %s1837_s12, 3 }
   0xa   : > { %p1896_p6 = por %p90_p3, %p39_p0  ;;  %s1839_s18 = smov [#allocation5]  }
   0xb   : > { %s2370_s15 = scalar_select %p1891_p4, 1, 0 }
   0xc   : > { %s2371_s16 = scalar_select %p1896_p6, 1, 0 }
   0xd   : > { %p1901_p8 = pnand %p1071_p5, %p97_p7  ;;  %s109_s19 = sshll.u32 %s1839_s18, 4  ;;  %s1905_s19 = int_to_ptr.vmem [resolvable:$true] %s109_s19 }
   0xe   : > { %s1917_s21 = sadd.s32 1, %s1837_s12   ;;  %s26_s22 = sadd.s32 1, %s1833_s11 }
   0xf   : > { %s2372_s17 = scalar_select %p1901_p8, 1, 0 }
  0x10   : > { %p1656_p9 = pneg %p1901_p8  ;;  %s23_s23 = ssub.s32 %s1837_s12, %s1917_s21 }
  0x11   : > { %s1709_s26 = scalar_lea.hbm %s2363_s1, 2048 }
  0x12   : > { %p1912_p11 = pnand %p1656_p9, %p2365_p1  ;;  %p1710_p12 = scmp.ne.s32.totalorder %s2363_s1, %s1709_s26 }
  0x13   : > { %p1716_p5 = scmp.lt.u32.totalorder %s1709_s26, %s2363_s1 }
  0x14   : > { %p1711_p13 = pneg %p1912_p11 }
  0x16   : > { %p1712_p0 = pnand %p1711_p13, %p1710_p12 }
  0x18   : > { %p1713_p3 = pneg %p1712_p0 }
  0x1a   : > { %p1718_p7 = pnand %p1716_p5, %p1713_p3 }
  0x1c   : > { %1721 = shalt.err (!%p1718_p7)
}
  0x1d   : > { %s1722_s3 = scalar_lea.vmem %s1905_s19, 2048  ;;  %p1730_p2 = scmp.lt.s32.totalorder %s1905_s19, %s1905_s19 }
  0x1e   : > { %p1723_p9 = scmp.ne.s32.totalorder %s1905_s19, %s1722_s3  ;;  %p1731_p6 = scmp.lt.s32.totalorder %s1722_s3, %s1722_s3 }
  0x20   : > { %p1725_p10 = pnand %p1723_p9, %p1711_p13  ;;  %p1732_p4 = por %p1731_p6, %p1730_p2 }
  0x22   : > { %p1726_p1 = pneg %p1725_p10 }
  0x24   : > { %p1733_p8 = pnand %p1732_p4, %p1726_p1 }
  0x26   : > { %1736 = shalt.err (!%p1733_p8)
}
  0x27   : > { %s1840_s4 = smov 128   ;;  %s1841_s5 = smov 8  }
  0x28   : > { %1659 = dma.hbm_to_vmem [thread:$0]  (!%p1912_p11), %s2363_s1, 2048, %s1905_s19, [#allocation6], %s1840_s4, %s1840_s4, %s1841_s5  }
  0x29   : > { %p24_p1 = scmp.eq.s32.totalorder %s23_s23, 0  ;;  %p33_p2 = scmp.ne.s32.totalorder %s1833_s11, %s1829_s10 }
  0x2a   : > { %p34_p4 = scmp.eq.s32.totalorder %s1837_s12, 0  ;;  %p1669_p6 = scmp.lt.s32.totalorder %s1837_s12, 2 }
  0x2b   : > { %s1951_s8 = scalar_select %p24_p1, %s1833_s11, %s26_s22  }
  0x2c   : > { %p35_p8 = por %p34_p4, %p33_p2  ;;  %p2374_p10 = scmp.eq.s32.totalorder %s1882_s13, 1 }
  0x2d   : > { %s123_s18 = sand.u32 1, %s1833_s11   ;;  %s1086_s20 = sshll.u32 %s1837_s12, 9 }
  0x2e   : > { %p1955_p12 = por %p2374_p10, %p33_p2  ;;  %s1074_s24 = sshll.u32 %s123_s18, 5 }
  0x2f   : > { %s1964_s27 = scalar_lea.hbm %s2362_s0, %s1086_s20  ;;  %s127_s19 = scalar_lea.vmem [#allocation2], %s1074_s24 }
  0x30   : > { %s134_s22 = sshll.u32 %s127_s19, 4  ;;  %p1966_p11 = pnand %p1669_p6, %p35_p8  ;;  %s1970_s22 = int_to_ptr.vmem [resolvable:$true] %s134_s22 }
  0x31   : > { %s1972_s28 = scalar_lea.sflag [#allocation3], %s123_s18  ;;  %s1737_s29 = scalar_lea.hbm %s1964_s27, 512 }
  0x32   : > { %p1738_p13 = scmp.ne.s32.totalorder %s1964_s27, %s1737_s29  ;;  %p1739_p0 = pneg %p1966_p11 }
  0x33   : > { %s1742_s6 = scalar_lea.hbm %s2362_s0, 1024  ;;  %p1743_p7 = scmp.lt.u32.totalorder %s1964_s27, %s2362_s0 }
  0x34   : > { %p1740_p3 = pnand %p1739_p0, %p1738_p13  ;;  %p1744_p9 = scmp.lt.u32.totalorder %s1742_s6, %s1737_s29 }
  0x35   : > { %p1746_p2 = scmp.lt.u32.totalorder %s1737_s29, %s1964_s27 }
  0x36   : > { %p1741_p5 = pneg %p1740_p3  ;;  %p1745_p1 = por %p1744_p9, %p1743_p7 }
  0x38   : > { %p1747_p4 = por %p1746_p2, %p1745_p1 }
  0x3a   : > { %p1748_p6 = pnand %p1747_p4, %p1741_p5 }
  0x3c   : > { %1751 = shalt.err (!%p1748_p6)
}
  0x3d   : > { %s1752_s18 = scalar_lea.vmem %s1970_s22, 512  ;;  %s1842_s24 = smov [#allocation2]  }
  0x3e   : > { %p1753_p8 = scmp.ne.s32.totalorder %s1970_s22, %s1752_s18  ;;  %s1757_s25 = sshll.u32 %s1842_s24, 4  ;;  %s1758_s25 = int_to_ptr.vmem [resolvable:$false] %s1757_s25 }
  0x3f   : > { %s1759_s26 = scalar_lea.vmem %s1758_s25, 1024  ;;  %p1760_p3 = scmp.lt.s32.totalorder %s1970_s22, %s1758_s25 }
  0x40   : > { %p1755_p10 = pnand %p1753_p8, %p1739_p0  ;;  %p1761_p7 = scmp.lt.s32.totalorder %s1759_s26, %s1752_s18 }
  0x42   : > { %p1756_p13 = pneg %p1755_p10  ;;  %p1762_p9 = por %p1761_p7, %p1760_p3 }
  0x44   : > { %p1763_p1 = pnand %p1762_p9, %p1756_p13 }
  0x46   : > { %1766 = shalt.err (!%p1763_p1)
}
  0x47   : > { %1663 = dma.hbm_to_vmem [thread:$0]  (!%p1966_p11), %s1964_s27, 512, %s1970_s22, %s1972_s28, %s1840_s4, %s1840_s4, %s1841_s5  }
  0x48   : > { %p2377_p0 = scmp.ne.s32.totalorder %s2372_s17, 0 }
  0x49   : > { %s2006_s19 = sand.u32 (!%p2377_p0), 1, %s1829_s10   ;;  %p2378_p5 = scmp.ne.s32.totalorder (!%p2377_p0), %s2370_s15, 0 }
  0x4a   : > { %146 = sbr.rel (%p2377_p0) target bundleno = 420 (0x1a4), region = 28  ;;  %s1078_s29 = sshll.u32 (!%p2377_p0), %s2006_s19, 5 }
  0x4b   : > { %s149_s30 = scalar_lea.sflag (!%p2377_p0), [#allocation3], %s2006_s19  ;;  %s2012_s23 = scalar_lea.vmem (!%p2377_p0), [#allocation2], %s1078_s29 }
  0x51   : > { %1812 = dma.done.wait (%p2378_p5), %s149_s30, 512  }
  0x52   : > { %1814 = vsyncadd (%p2378_p5), %s149_s30, 4294966784  ;;  %p2379_p11 = scmp.eq.s32.totalorder %s1882_s13, 0 }
  0x54   : > { %1816 = dma.done.wait (%p2379_p11), [#allocation6], 2048   ;;  %p2380_p2 = pmov %p2379_p11 }
  0x55   : > { %v183_v0 = vld [vmem:[#allocation5] sm:$0xff]  ;;  %v184_v1 = vld [vmem:[#allocation5 + $0x8] sm:$0xff]  ;;  %v185_v2 = vld [vmem:[#allocation5 + $0x10] sm:$0xff]  ;;  %s176_s15 = scalar_lea.vmem [#allocation7], %s1078_s29  ;;  %s1087_s4 = sshll.u32 %s1882_s13, 9 }
  0x56   : > { %1818 = vsyncadd (%p2380_p2), [#allocation6], 4294965248  ;;  %v200_v3 = vand.u32 4294901760, %v183_v0  ;;  %v203_v4 = vand.u32 4294901760, %v184_v1  ;;  %v186_v5 = vld [vmem:[#allocation5 + $0x18] sm:$0xff]  ;;  %v206_v6 = vand.u32 4294901760, %v185_v2  ;;  %s2318_s22 = scalar_lea.hbm %s2364_s2, %s1087_s4 }
  0x57   : > { %v2022_v7 = vld [vmem:[#allocation5 + $0x20] sm:$0xff]  ;;  %v2024_v8 = vld [vmem:[#allocation5 + $0x28] sm:$0xff]  ;;  %v209_v9 = vand.u32 4294901760, %v186_v5  ;;  %v2032_v14 = vld [vmem:[#allocation5 + $0x30] sm:$0xff]  ;;  %s987_s17 = sshll.u32 %s176_s15, 4  ;;  %s974_s13 = scalar_lea.sflag [#allocation4], %s2006_s19  ;;  %s2313_s17 = int_to_ptr.vmem [resolvable:$true] %s987_s17 }
  0x58   : > { %v2026_v10 = vpack.c.bf16 %v203_v4, %v200_v3  ;;  %v212_v11 = vand.u32 4294901760, %v2022_v7  ;;  %v215_v12 = vand.u32 4294901760, %v2024_v8  ;;  %v2034_v15 = vld [vmem:[#allocation5 + $0x38] sm:$0xff]  ;;  %v179_v16 = vld [vmem:[%s2012_s23] sm:$0xff]  ;;  %v218_v19 = vand.u32 4294901760, %v2032_v14  ;;  %v2055_v22 = vld [vmem:[#allocation5 + $0x48] sm:$0xff] }
  0x59   : > { %v2030_v13 = vpack.c.bf16 %v209_v9, %v206_v6  ;;  %v2041_v17 = vand.u32 4294901760, %v179_v16  ;;  %v221_v20 = vand.u32 4294901760, %v2034_v15  ;;  %v2053_v21 = vld [vmem:[#allocation5 + $0x40] sm:$0xff]  ;;  %v227_v27 = vand.u32 4294901760, %v2055_v22  ;;  %v2073_v28 = vld [vmem:[#allocation5 + $0x50] sm:$0xff]  ;;  %v2075_v29 = vld [vmem:[#allocation5 + $0x58] sm:$0xff] }
  0x5a   : > { %1437 = vmatprep.subr.bf16.mxu1 %v2026_v10  ;;  %1533 = vmatprep.subr.bf16.mxu0 %v2026_v10  ;;  %v2049_v18 = vpack.c.bf16 %v215_v12, %v212_v11  ;;  %v224_v26 = vand.u32 4294901760, %v2053_v21  ;;  %v230_v31 = vand.u32 4294901760, %v2073_v28  ;;  %v180_v33 = vld [vmem:[%s2012_s23 + $0x8] sm:$0xff]  ;;  %v233_v35 = vand.u32 4294901760, %v2075_v29  ;;  %v2091_v36 = vld [vmem:[#allocation5 + $0x60] sm:$0xff]  ;;  %v2099_v40 = vld [vmem:[#allocation5 + $0x70] sm:$0xff] }
  0x5b   : > { %1439 = vmatpush3.bf16.msra.mxu1 %v2026_v10  ;;  %1535 = vmatpush3.bf16.msra.mxu0 %v2026_v10  ;;  %v2058_v23 = vsub.f32 %v179_v16, %v2041_v17  ;;  %v2069_v25 = vpack.c.bf16 %v221_v20, %v218_v19  ;;  %v2093_v37 = vld [vmem:[#allocation5 + $0x68] sm:$0xff]  ;;  %v2095_v38 = vsub.f32 %v183_v0, %v200_v3  ;;  %v2101_v41 = vand.u32 4294901760, %v180_v33  ;;  %v2111_v46 = vld [vmem:[#allocation5 + $0x78] sm:$0xff]  ;;  %v181_v55 = vld [vmem:[%s2012_s23 + $0x10] sm:$0xff]  ;;  %s1767_s28 = scalar_lea.vmem %s2313_s17, 512  ;;  %s1843_s3 = smov [#allocation7]  }
  0x5c   : > { %1441 = vmatprep.subr.bf16.mxu1 %v2030_v13  ;;  %1537 = vmatprep.subr.bf16.mxu0 %v2030_v13  ;;  %v2088_v34 = vpack.c.bf16 %v227_v27, %v224_v26  ;;  %v2097_v39 = vsub.f32 %v184_v1, %v203_v4  ;;  %v2103_v42 = vsub.f32 %v185_v2, %v206_v6  ;;  %v236_v44 = vand.u32 4294901760, %v2091_v36  ;;  %v182_v62 = vld [vmem:[%s2012_s23 + $0x18] sm:$0xff]  ;;  %p1768_p4 = scmp.ne.s32.totalorder %s2313_s17, %s1767_s28  ;;  %s1771_s6 = sshll.u32 %s1843_s3, 4  ;;  %s1772_s6 = int_to_ptr.vmem [resolvable:$false] %s1771_s6 }
  0x5d   : > { %v282_v24 = vand.u32 4294901760, %v2058_v23  ;;  %v2105_v43 = vsub.f32 %v186_v5, %v209_v9  ;;  %v239_v45 = vand.u32 4294901760, %v2093_v37  ;;  %v2119_v47 = vpack.c.bf16 %v233_v35, %v230_v31  ;;  %s1773_s7 = scalar_lea.vmem %s1772_s6, 1024  ;;  %p1774_p10 = scmp.lt.s32.totalorder %s2313_s17, %s1772_s6 }
  0x5e   : > { %v323_v48 = vand.u32 4294901760, %v2095_v38  ;;  %v330_v49 = vand.u32 4294901760, %v2097_v39  ;;  %v2369_v50 = vand.u32 4294901760, %v2099_v40  ;;  %v2368_v51 = vand.u32 4294901760, %v2111_v46  ;;  %p1769_p6 = pnand %p1768_p4, %p1955_p12  ;;  %p1775_p13 = scmp.lt.s32.totalorder %s1773_s7, %s1767_s28 }
  0x5f   : > { %1443 = vmatpush3.bf16.msra.mxu1 %v2030_v13  ;;  %1539 = vmatpush3.bf16.msra.mxu0 %v2030_v13  ;;  %v283_v30 = vsub.f32 %v2058_v23, %v282_v24  ;;  %v2126_v52 = vsub.f32 %v180_v33, %v2101_v41  ;;  %v337_v53 = vand.u32 4294901760, %v2103_v42  ;;  %v344_v54 = vand.u32 4294901760, %v2105_v43 }
  0x60   : > { %1445 = vmatprep.subr.bf16.mxu1 %v2049_v18  ;;  %1541 = vmatprep.subr.bf16.mxu0 %v2049_v18  ;;  %v2137_v56 = vpack.c.bf16 %v239_v45, %v236_v44  ;;  %v2142_v57 = vsub.f32 %v2022_v7, %v212_v11  ;;  %v324_v58 = vsub.f32 %v2095_v38, %v323_v48  ;;  %v2153_v61 = vand.u32 4294901760, %v181_v55  ;;  %p1770_p8 = pneg %p1769_p6  ;;  %p1776_p3 = por %p1775_p13, %p1774_p10 }
  0x61   : > { %1354 = vmatprep.mubr.f32.mxu0 %v282_v24  ;;  %v284_v32 = vand.u32 4294901760, %v283_v30  ;;  %v331_v59 = vsub.f32 %v2097_v39, %v330_v49  ;;  %v2151_v60 = vsub.f32 %v2024_v8, %v215_v12  ;;  %v2160_v63 = vpack.c.bf16 %v2368_v51, %v2369_v50 }
  0x62   : > { %v292_v0 = vand.u32 4294901760, %v2126_v52  ;;  %v338_v1 = vsub.f32 %v2103_v42, %v337_v53  ;;  %v345_v2 = vsub.f32 %v2105_v43, %v344_v54  ;;  %v351_v3 = vand.u32 4294901760, %v2142_v57  ;;  %p1777_p7 = pnand %p1776_p3, %p1770_p8 }
  0x63   : > { %1447 = vmatpush3.bf16.msra.mxu1 %v2049_v18  ;;  %1543 = vmatpush3.bf16.msra.mxu0 %v2049_v18  ;;  %v2171_v4 = vsub.f32 %v2032_v14, %v218_v19  ;;  %v2176_v5 = vsub.f32 %v2034_v15, %v221_v20  ;;  %v2179_v6 = vsub.f32 %v181_v55, %v2153_v61  ;;  %v325_v7 = vand.u32 4294901760, %v324_v58 }
  0x64   : > { %1449 = vmatprep.subr.bf16.mxu1 %v2069_v25  ;;  %1545 = vmatprep.subr.bf16.mxu0 %v2069_v25  ;;  %v332_v8 = vand.u32 4294901760, %v331_v59  ;;  %v358_v9 = vand.u32 4294901760, %v2151_v60  ;;  %v2184_v11 = vand.u32 4294901760, %v182_v62  ;;  %v1564_v12 = vpack.c.bf16 %v330_v49, %v323_v48 }
  0x65   : > { %1240 = vmatprep.mubr.f32.mxu1 %v284_v32  ;;  %v302_v14 = vand.u32 4294901760, %v2179_v6  ;;  %v293_v16 = vsub.f32 %v2126_v52, %v292_v0  ;;  %v339_v15 = vand.u32 4294901760, %v338_v1  ;;  %v2191_v19 = vsub.f32 %v2053_v21, %v224_v26 }
  0x66   : > { %v2194_v20 = vsub.f32 %v182_v62, %v2184_v11  ;;  %v346_v24 = vand.u32 4294901760, %v345_v2  ;;  %v352_v30 = vsub.f32 %v2142_v57, %v351_v3  ;;  %v365_v32 = vand.u32 4294901760, %v2171_v4 }
  0x67   : > { %1451 = vmatpush3.bf16.msra.mxu1 %v2069_v25  ;;  %1547 = vmatpush3.bf16.msra.mxu0 %v2069_v25  ;;  %v372_v33 = vand.u32 4294901760, %v2176_v5  ;;  %v1468_v21 = vpack.c.bf16 %v332_v8, %v325_v7  ;;  %v359_v26 = vsub.f32 %v2151_v60, %v358_v9  ;;  %v2207_v48 = vsub.f32 %v2055_v22, %v227_v27 }
  0x68   : > { %1453 = vmatprep.subr.bf16.mxu1 %v2088_v34  ;;  %1549 = vmatprep.subr.bf16.mxu0 %v2088_v34  ;;  %v312_v49 = vand.u32 4294901760, %v2194_v20  ;;  %v1568_v55 = vpack.c.bf16 %v344_v54, %v337_v53  ;;  %v303_v58 = vsub.f32 %v2179_v6, %v302_v14  ;;  %v294_v59 = vand.u32 4294901760, %v293_v16 }
  0x69   : > { %v379_v62 = vand.u32 4294901760, %v2191_v19  ;;  %v2215_v1 = vsub.f32 %v2073_v28, %v230_v31  ;;  %v366_v22 = vsub.f32 %v2171_v4, %v365_v32  ;;  %v373_v27 = vsub.f32 %v2176_v5, %v372_v33 }
  0x6a   : > { %v313_v2 = vsub.f32 %v2194_v20, %v312_v49  ;;  %v2225_v53 = vsub.f32 %v2075_v29, %v233_v35  ;;  %v1472_v54 = vpack.c.bf16 %v346_v24, %v339_v15  ;;  %v353_v28 = vand.u32 4294901760, %v352_v30 }
  0x6b   : > { %1455 = vmatpush3.bf16.msra.mxu1 %v2088_v34  ;;  %1551 = vmatpush3.bf16.msra.mxu0 %v2088_v34  ;;  %v360_v31 = vand.u32 4294901760, %v359_v26  ;;  %v386_v7 = vand.u32 4294901760, %v2207_v48  ;;  %v304_v8 = vand.u32 4294901760, %v303_v58  ;;  %v1572_v16 = vpack.c.bf16 %v358_v9, %v351_v3 }
  0x6c   : > { %1457 = vmatprep.subr.bf16.mxu1 %v2119_v47  ;;  %1553 = vmatprep.subr.bf16.mxu0 %v2119_v47  ;;  %v380_v51 = vsub.f32 %v2191_v19, %v379_v62  ;;  %v2232_v50 = vsub.f32 %v2091_v36, %v236_v44  ;;  %v314_v29 = vand.u32 4294901760, %v313_v2  ;;  %v367_v35 = vand.u32 4294901760, %v366_v22 }
  0x6d   : > { %v374_v15 = vand.u32 4294901760, %v373_v27  ;;  %v393_v24 = vand.u32 4294901760, %v2215_v1  ;;  %v400_v30 = vand.u32 4294901760, %v2225_v53  ;;  %v387_v3 = vsub.f32 %v2207_v48, %v386_v7 }
  0x6e   : > { %v2240_v9 = vsub.f32 %v2093_v37, %v239_v45  ;;  %v1576_v36 = vpack.c.bf16 %v372_v33, %v365_v32  ;;  %v381_v44 = vand.u32 4294901760, %v380_v51  ;;  %v407_v58 = vand.u32 4294901760, %v2232_v50 }
  0x6f   : > { %1459 = vmatpush3.bf16.msra.mxu1 %v2119_v47  ;;  %1555 = vmatpush3.bf16.msra.mxu0 %v2119_v47  ;;  %v401_v26 = vsub.f32 %v2225_v53, %v400_v30  ;;  %v2381_v45 = vand.u32 4294901760, %v2099_v40  ;;  %v1580_v33 = vpack.c.bf16 %v386_v7, %v379_v62 }
  0x70   : > { %1461 = vmatprep.subr.bf16.mxu1 %v2137_v56  ;;  %1557 = vmatprep.subr.bf16.mxu0 %v2137_v56  ;;  %v414_v37 = vand.u32 4294901760, %v2240_v9  ;;  %v408_v2 = vsub.f32 %v2232_v50, %v407_v58 }
  0x71   : > { %v2249_v51 = vsub.f32 %v2099_v40, %v2381_v45 }
  0x72   : > { %v415_v22 = vsub.f32 %v2240_v9, %v414_v37  ;;  %v409_v62 = vand.u32 4294901760, %v408_v2 }
  0x73   : > { %1463 = vmatpush3.bf16.msra.mxu1 %v2137_v56  ;;  %1559 = vmatpush3.bf16.msra.mxu0 %v2137_v56  ;;  %v421_v27 = vand.u32 4294901760, %v2249_v51 }
  0x74   : > { %1465 = vmatprep.subr.bf16.mxu1 %v2160_v63  ;;  %1561 = vmatprep.subr.bf16.mxu0 %v2160_v63 }
  0x75   : > { %v422_v7 = vsub.f32 %v2249_v51, %v421_v27 }
  0x77   : > { %1467 = vmatpush3.bf16.msra.mxu1 %v2160_v63  ;;  %1563 = vmatpush3.bf16.msra.mxu0 %v2160_v63 }
  0x78   : > { %1469 = vmatprep.subr.bf16.mxu1 %v1468_v21  ;;  %1565 = vmatprep.subr.bf16.mxu0 %v1564_v12 }
  0x7a   : > { %1241 = vmatmul.mubr.f32.vlgmr.msra.gmra.mrb[0].mxu1 %v294_v59  ;;  %1355 = vmatmul.mubr.f32.vlgmr.msra.gmra.mrb[0].mxu0 %v292_v0  ;;  %v1476_v0 = vpack.c.bf16 %v360_v31, %v353_v28  ;;  %v388_v59 = vand.u32 4294901760, %v387_v3  ;;  %v1584_v28 = vpack.c.bf16 %v400_v30, %v393_v24  ;;  %v416_v31 = vand.u32 4294901760, %v415_v22 }
  0x7b   : > { %1471 = vmatpush3.bf16.msra.mxu1 %v1468_v21  ;;  %1567 = vmatpush3.bf16.msra.mxu0 %v1564_v12  ;;  %v1480_v12 = vpack.c.bf16 %v374_v15, %v367_v35  ;;  %v394_v21 = vsub.f32 %v2215_v1, %v393_v24  ;;  %v423_v35 = vand.u32 4294901760, %v422_v7  ;;  %v1504_v3 = vpack.c.bf16 %v2105_v43, %v2103_v42 }
  0x7c   : > { %1473 = vmatprep.subr.bf16.mxu1 %v1472_v54  ;;  %1569 = vmatprep.subr.bf16.mxu0 %v1568_v55  ;;  %v1484_v40 = vpack.c.bf16 %v388_v59, %v381_v44 }
  0x7d   : > { %1243 = vmatprep.mubr.f32.mxu1 %v304_v8  ;;  %1357 = vmatprep.mubr.f32.mxu0 %v302_v14  ;;  %v2382_v14 = vand.u32 4294901760, %v2111_v46 }
  0x7e   : > { %1244 = vmatmul.mubr.f32.gmra.mrb[2].mxu1 %v314_v29  ;;  %1358 = vmatmul.mubr.f32.gmra.mrb[2].mxu0 %v312_v49  ;;  %v395_v49 = vand.u32 4294901760, %v394_v21  ;;  %v1588_v29 = vpack.c.bf16 %v414_v37, %v407_v58 }
  0x7f   : > { %1475 = vmatpush3.bf16.msra.mxu1 %v1472_v54  ;;  %1571 = vmatpush3.bf16.msra.mxu0 %v1568_v55  ;;  %v2254_v32 = vsub.f32 %v2111_v46, %v2382_v14  ;;  %v402_v55 = vand.u32 4294901760, %v401_v26 }
  0x80   : > { %1477 = vmatprep.subr.bf16.mxu1 %v1476_v0  ;;  %1573 = vmatprep.subr.bf16.mxu0 %v1572_v16 }
  0x81   : > { %1278 = vmatprep.mubr.f32.mxu1 %v2041_v17  ;;  %1392 = vmatprep.mubr.f32.mxu0 %v2041_v17  ;;  %v428_v46 = vand.u32 4294901760, %v2254_v32  ;;  %v1488_v54 = vpack.c.bf16 %v402_v55, %v395_v49 }
  0x83   : > { %1479 = vmatpush3.bf16.msra.mxu1 %v1476_v0  ;;  %1575 = vmatpush3.bf16.msra.mxu0 %v1572_v16  ;;  %v429_v8 = vsub.f32 %v2254_v32, %v428_v46  ;;  %v1492_v16 = vpack.c.bf16 %v416_v31, %v409_v62  ;;  %v1592_v30 = vpack.c.bf16 %v428_v46, %v421_v27 }
  0x84   : > { %1481 = vmatprep.subr.bf16.mxu1 %v1480_v12  ;;  %1577 = vmatprep.subr.bf16.mxu0 %v1576_v36  ;;  %v1500_v0 = vpack.c.bf16 %v2097_v39, %v2095_v38  ;;  %v1508_v38 = vpack.c.bf16 %v2151_v60, %v2142_v57  ;;  %v1516_v39 = vpack.c.bf16 %v2207_v48, %v2191_v19 }
  0x85   : > { %v430_v15 = vand.u32 4294901760, %v429_v8 }
  0x87   : > { %1483 = vmatpush3.bf16.msra.mxu1 %v1480_v12  ;;  %1579 = vmatpush3.bf16.msra.mxu0 %v1576_v36  ;;  %v1496_v24 = vpack.c.bf16 %v430_v15, %v423_v35 }
  0x88   : > { %1485 = vmatprep.subr.bf16.mxu1 %v1484_v40  ;;  %1581 = vmatprep.subr.bf16.mxu0 %v1580_v33 }
  0x8b   : > { %1487 = vmatpush3.bf16.msra.mxu1 %v1484_v40  ;;  %1583 = vmatpush3.bf16.msra.mxu0 %v1580_v33 }
  0x8c   : > { %1489 = vmatprep.subr.bf16.mxu1 %v1488_v54  ;;  %1585 = vmatprep.subr.bf16.mxu0 %v1584_v28 }
  0x8f   : > { %1491 = vmatpush3.bf16.msra.mxu1 %v1488_v54  ;;  %1587 = vmatpush3.bf16.msra.mxu0 %v1584_v28 }
  0x90   : > { %1493 = vmatprep.subr.bf16.mxu1 %v1492_v16  ;;  %1589 = vmatprep.subr.bf16.mxu0 %v1588_v29 }
  0x93   : > { %1495 = vmatpush3.bf16.msra.mxu1 %v1492_v16  ;;  %1591 = vmatpush3.bf16.msra.mxu0 %v1588_v29 }
  0x94   : > { %1497 = vmatprep.subr.bf16.mxu1 %v1496_v24  ;;  %1593 = vmatprep.subr.bf16.mxu0 %v1592_v30 }
  0x97   : > { %1499 = vmatpush3.bf16.msra.mxu1 %v1496_v24  ;;  %1595 = vmatpush3.bf16.msra.mxu0 %v1592_v30 }
  0x98   : > { %1501 = vmatprep.subr.bf16.mxu1 %v1500_v0  ;;  %1597 = vmatprep.subr.bf16.mxu0 %v2026_v10 }
  0x9a   : > { %1279 = vmatmul.mubr.f32.vlgmr.msra.gmra.mrb[0].mxu1 %v2101_v41  ;;  %1393 = vmatmul.mubr.f32.vlgmr.msra.gmra.mrb[0].mxu0 %v2101_v41 }
  0x9b   : > { %1503 = vmatpush3.bf16.msra.mxu1 %v1500_v0  ;;  %1599 = vmatpush3.bf16.msra.mxu0 %v2026_v10  ;;  %v1512_v10 = vpack.c.bf16 %v2176_v5, %v2171_v4 }
  0x9c   : > { %1505 = vmatprep.subr.bf16.mxu1 %v1504_v3  ;;  %1601 = vmatprep.subr.bf16.mxu0 %v2030_v13 }
  0x9d   : > { %1281 = vmatprep.mubr.f32.mxu1 %v2153_v61  ;;  %1395 = vmatprep.mubr.f32.mxu0 %v2153_v61 }
  0x9e   : > { %1282 = vmatmul.mubr.f32.gmra.mrb[2].mxu1 %v2184_v11  ;;  %1396 = vmatmul.mubr.f32.gmra.mrb[2].mxu0 %v2184_v11 }
  0x9f   : > { %1507 = vmatpush3.bf16.msra.mxu1 %v1504_v3  ;;  %1603 = vmatpush3.bf16.msra.mxu0 %v2030_v13  ;;  %v1520_v13 = vpack.c.bf16 %v2225_v53, %v2215_v1 }
  0xa0   : > { %1509 = vmatprep.subr.bf16.mxu1 %v1508_v38  ;;  %1605 = vmatprep.subr.bf16.mxu0 %v2049_v18 }
  0xa1   : > { %1316 = vmatprep.mubr.f32.mxu1 %v2058_v23  ;;  %1430 = vmatprep.mubr.f32.mxu0 %v2041_v17  ;;  %v1524_v17 = vpack.c.bf16 %v2240_v9, %v2232_v50 }
  0xa3   : > { %1511 = vmatpush3.bf16.msra.mxu1 %v1508_v38  ;;  %1607 = vmatpush3.bf16.msra.mxu0 %v2049_v18  ;;  %v1528_v18 = vpack.c.bf16 %v2254_v32, %v2249_v51 }
  0xa4   : > { %1513 = vmatprep.subr.bf16.mxu1 %v1512_v10  ;;  %1609 = vmatprep.subr.bf16.mxu0 %v2069_v25 }
  0xa7   : > { %1515 = vmatpush3.bf16.msra.mxu1 %v1512_v10  ;;  %1611 = vmatpush3.bf16.msra.mxu0 %v2069_v25 }
  0xa8   : > { %1517 = vmatprep.subr.bf16.mxu1 %v1516_v39  ;;  %1613 = vmatprep.subr.bf16.mxu0 %v2088_v34 }
  0xab   : > { %1519 = vmatpush3.bf16.msra.mxu1 %v1516_v39  ;;  %1615 = vmatpush3.bf16.msra.mxu0 %v2088_v34 }
  0xac   : > { %1521 = vmatprep.subr.bf16.mxu1 %v1520_v13  ;;  %1617 = vmatprep.subr.bf16.mxu0 %v2119_v47 }
  0xaf   : > { %1523 = vmatpush3.bf16.msra.mxu1 %v1520_v13  ;;  %1619 = vmatpush3.bf16.msra.mxu0 %v2119_v47 }
  0xb0   : > { %1525 = vmatprep.subr.bf16.mxu1 %v1524_v17  ;;  %1621 = vmatprep.subr.bf16.mxu0 %v2137_v56 }
  0xb3   : > { %1527 = vmatpush3.bf16.msra.mxu1 %v1524_v17  ;;  %1623 = vmatpush3.bf16.msra.mxu0 %v2137_v56 }
  0xb4   : > { %1529 = vmatprep.subr.bf16.mxu1 %v1528_v18  ;;  %1625 = vmatprep.subr.bf16.mxu0 %v2160_v63 }
  0xb7   : > { %1531 = vmatpush3.bf16.msra.mxu1 %v1528_v18  ;;  %1627 = vmatpush3.bf16.msra.mxu0 %v2160_v63 }
  0xba   : > { %1317 = vmatmul.mubr.f32.vlgmr.msra.gmra.mrb[0].mxu1 %v2126_v52  ;;  %1431 = vmatmul.mubr.f32.vlgmr.msra.gmra.mrb[0].mxu0 %v2101_v41 }
  0xbb   : > { %1319 = vmatprep.mubr.f32.mxu1 %v2179_v6  ;;  %1433 = vmatprep.mubr.f32.mxu0 %v2153_v61 }
  0xbe   : > { %1320 = vmatmul.mubr.f32.gmra.mrb[2].mxu1 %v2194_v20  ;;  %1434 = vmatmul.mubr.f32.gmra.mrb[2].mxu0 %v2184_v11 }
 0x18d   : > { %v1318_v23 = vpop.f32.mrb[0].mxu1  ;;  %v1432_v25 = vpop.f32.mrb[0].mxu0 }
 0x18e   : > { %v1628_v34 = vadd.f32 %v1432_v25, %v1318_v23  ;;  %v589_v42 = vpop.f32.mrb[1].mxu1  ;;  %v947_v43 = vpop.f32.mrb[1].mxu0 }
 0x18f   : > { %v1629_v47 = vadd.f32 %v947_v43, %v589_v42 }
 0x190   : > { %970 = vst [vmem:[%s176_s15 + $0x8] sm:$0xff] %v1628_v34 }
 0x191   : > { %969 = vst [vmem:[%s176_s15] sm:$0xff] %v1629_v47  ;;  %v1321_v41 = vpop.f32.mrb[2].mxu1  ;;  %v1435_v50 = vpop.f32.mrb[2].mxu0 }
 0x192   : > { %v1630_v52 = vadd.f32 %v1435_v50, %v1321_v41  ;;  %v603_v56 = vpop.f32.mrb[3].mxu1  ;;  %v959_v57 = vpop.f32.mrb[3].mxu0 }
 0x193   : > { %v1631_v60 = vadd.f32 %v959_v57, %v603_v56 }
 0x194   : > { %972 = vst [vmem:[%s176_s15 + $0x18] sm:$0xff] %v1630_v52 }
 0x195   : > { %971 = vst [vmem:[%s176_s15 + $0x10] sm:$0xff] %v1631_v60 }
 0x196   : > { %1780 = shalt.err (!%p1777_p7)
}
 0x197   : > { %s1781_s20 = scalar_lea.hbm %s2318_s22, 512  ;;  %s1785_s25 = scalar_lea.hbm %s2364_s2, 1024 }
 0x198   : > { %p1782_p9 = scmp.ne.s32.totalorder %s2318_s22, %s1781_s20  ;;  %p1786_p5 = scmp.lt.u32.totalorder %s2318_s22, %s2364_s2 }
 0x199   : > { %p1787_p11 = scmp.lt.u32.totalorder %s1785_s25, %s1781_s20  ;;  %p1789_p4 = scmp.lt.u32.totalorder %s1781_s20, %s2318_s22 }
 0x19a   : > { %p1783_p1 = pnand %p1782_p9, %p1955_p12 }
 0x19b   : > { %p1788_p2 = por %p1787_p11, %p1786_p5 }
 0x19c   : > { %p1784_p0 = pneg %p1783_p1 }
 0x19d   : > { %p1790_p6 = por %p1789_p4, %p1788_p2 }
 0x19f   : > { %p1791_p8 = pnand %p1790_p6, %p1784_p0 }
 0x1a1   : > { %1794 = shalt.err (!%p1791_p8)
}
 0x1a2   : > { %s1844_s30 = smov 128   ;;  %s1845_s23 = smov 8  }
 0x1a3   : > { %1654 = dma.vmem_to_hbm [thread:$0]  (%p1955_p12), %s2313_s17, 512, %s2318_s22, %s974_s13, %s1844_s30, %s1844_s30, %s1845_s23  }
 0x1a4 PF: > { %s1002_s15 = sand.u32 1, %s1825_s9   ;;  %p2383_p10 = scmp.ne.s32.totalorder %s2371_s16, 0 }
 0x1a5   : > { %p2384_p13 = scmp.ge.s32.totalorder %s1837_s12, 2  ;;  %s1003_s4 = scalar_lea.sflag [#allocation4], %s1002_s15 }
 0x1a7   : > { %p1665_p3 = pnand %p2384_p13, %p2383_p10 }
 0x1a9   : > { %1820 = dma.done.wait (!%p1665_p3), %s1003_s4, 512  }
 0x1aa   : > { %1822 = vsyncadd (!%p1665_p3), %s1003_s4, 4294966784  ;;  %p16_p7 = scmp.ge.s32.totalorder %s1917_s21, 4   ;;  %s2385_s9 = smov %s1829_s10 }
 0x1ab   : > { %s2386_s10 = smov %s1833_s11  ;;  %s2387_s11 = smov %s1951_s8 }
 0x1ac   : > { %s2388_s12 = smov %s1917_s21  ;;  %18 = sbr.rel (!%p16_p7) target bundleno = 6 (0x6), region = 77 }
 0x1b3   :  { %1008 = vsyncpa [#allocation3], 1 }
 0x1b4   :  { %1010 = vsyncpa [#allocation3 + $0x1], 1 }
 0x1b5   :  { %1011 = vsyncpa [#allocation6], 1 }
 0x1b6   :  { %1012 = vsyncpa [#allocation4], 1 }
 0x1b7   :  { %1014 = vsyncpa [#allocation4 + $0x1], 1 }

</bundles_post_ra>
